<compile_context>
chip_gen: v7x
topology: tpu7x:2x2x1
jax: 0.10.0
libtpu: 0.0.40
codegen_flags: <defaults>
</compile_context>

<pallas_src>
import functools
import math

import jax
import jax.numpy as jnp
from jax import lax
from jax.experimental import pallas as pl
from jax.experimental.pallas import tpu as pltpu


# VMEM budget (bytes) for the double-buffered x block (lane-padded footprint).
# Conservative for every generation once the scoped limit is raised to 32 MiB.
_X_VMEM_BUDGET = 24 * 1024 * 1024
_VMEM_LIMIT_BYTES = 32 * 1024 * 1024   # > v5e's 16 MiB default, < v7x's ~48 MiB ceiling


def _round_up(x, m):
    return (x + m - 1) // m * m


def _cdiv(a, b):
    return (a + b - 1) // b


def _mlp_kernel(x_ref,
                w1_ref, b1_ref,
                w2_ref, b2_ref,
                w3_ref, b3_ref,
                w4_ref, b4_ref,
                w5_ref, b5_ref,
                o_ref, *, chunk, num_chunks):
    """Fused 5-layer MLP, batch-on-lanes compute layout.

    x_ref: (TILE_B, in)  native row-major x block (one contiguous DMA).
    w_i:   (out_i, in_i) in the compute dtype (bf16 by default).
    b_i:   (out_i, 1)    f32.
    o_ref: (1, TILE_B)   f32 — lane-dense output stores.

    The tile is processed in `chunk`-column sub-chunks so every intermediate
    of the 5-layer chain stays in vregs (no VMEM round trips).
    """
    w1 = w1_ref[...]; b1 = b1_ref[...]
    w2 = w2_ref[...]; b2 = b2_ref[...]
    w3 = w3_ref[...]; b3 = b3_ref[...]
    w4 = w4_ref[...]; b4 = b4_ref[...]
    w5 = w5_ref[...]; b5 = b5_ref[...]

    def body(c, carry):
        off = pl.multiple_of(c * chunk, chunk)
        # (chunk, in) slice; cast to the matmul dtype in-kernel (no extra HBM pass).
        xb = x_ref[pl.ds(off, chunk), :].astype(w1.dtype)
        # Layer 1 as W1 @ xb^T via dot_general: batch lands on the lane axis
        # without any wrapper-side transpose of x.
        h = lax.dot_general(w1, xb,
                            dimension_numbers=(((1,), (1,)), ((), ())),
                            preferred_element_type=jnp.float32) + b1
        h = jnp.maximum(h, 0.0)

        h = jnp.dot(w2, h.astype(w2.dtype),
                    preferred_element_type=jnp.float32) + b2
        h = jnp.maximum(h, 0.0)

        h = jnp.dot(w3, h.astype(w3.dtype),
                    preferred_element_type=jnp.float32) + b3
        h = jnp.maximum(h, 0.0)

        h = jnp.dot(w4, h.astype(w4.dtype),
                    preferred_element_type=jnp.float32) + b4
        h = jnp.maximum(h, 0.0)

        y = jnp.dot(w5, h.astype(w5.dtype),
                    preferred_element_type=jnp.float32) + b5

        o_ref[:, pl.ds(off, chunk)] = y.astype(o_ref.dtype)
        return carry

    unroll = True if num_chunks <= 8 else 8
    lax.fori_loop(0, num_chunks, body, 0, unroll=unroll)


def prepare_regressor_params(params, compute_dtype=jnp.bfloat16):
    """Lay out parameters once for the kernel.

    params: list of (W, b) in PyTorch layout (W: (out, in), b: (out,)).
    Returns list of (W[out,in] in compute_dtype, b[out,1] in f32).
    bf16 weights keep the MXU on its native path; accumulation stays f32.
    """
    prepared = []
    for (w, b) in params:
        prepared.append((jnp.asarray(w, compute_dtype),
                         jnp.asarray(b, jnp.float32).reshape(-1, 1)))
    return prepared


def _choose_tiling(batch, in_features, x_itemsize, tile_b):
    """Pick (tile, n_steps): tile multiple of 128, VMEM-budgeted, >=2 grid
    steps when the padded batch allows it (v7x megacore)."""
    b128 = _round_up(max(batch, 1), 128)
    # VMEM footprint of an x block is lane-padded: tile * round_up(in,128) * itemsize.
    padded_in = _round_up(in_features, 128)
    vmem_cap = max(128, (_X_VMEM_BUDGET // (2 * padded_in * x_itemsize)) // 128 * 128)
    cap = max(128, min((tile_b // 128) * 128, vmem_cap))
    n_steps = _cdiv(b128, cap)
    if b128 >= 2 * 128:
        n_steps = max(n_steps, 2)       # keep both v7x TensorCores busy
    tile = _round_up(_cdiv(b128, n_steps), 128)
    return tile, n_steps


def regressor_forward(x, prepared_params, *, tile_b=16384):
    """x: (B, input_size) float.  prepared_params: from prepare_regressor_params.
    Returns (B, 1) float32."""
    B, in_features = x.shape
    tile, n_steps = _choose_tiling(B, in_features, x.dtype.itemsize, tile_b)
    b_out = n_steps * tile
    chunk = 256 if tile % 256 == 0 else 128
    num_chunks = tile // chunk

    # Only pad when even the first block would overrun the array (tiny batches,
    # negligible cost).  Larger ragged tails rely on Pallas' masked boundary
    # DMA, so x is never copied / transposed in HBM on the hot path.
    if B < tile:
        x = jnp.pad(x, ((0, tile - B), (0, 0)))

    kernel = functools.partial(_mlp_kernel, chunk=chunk, num_chunks=num_chunks)

    kernel_args = [x]
    in_specs = [pl.BlockSpec((tile, in_features), lambda i: (i, 0))]
    param_bytes = 0
    flops = 0
    for (w, b) in prepared_params:
        kernel_args.append(w)
        kernel_args.append(b)
        # Constant index_map -> weights/biases stay VMEM-resident across steps.
        in_specs.append(pl.BlockSpec(w.shape, lambda i: (0, 0)))
        in_specs.append(pl.BlockSpec(b.shape, lambda i: (0, 0)))
        param_bytes += w.size * w.dtype.itemsize + b.size * b.dtype.itemsize
        flops += 2 * B * int(w.shape[0]) * int(w.shape[1])

    cost = pl.CostEstimate(
        flops=flops,
        transcendentals=0,
        bytes_accessed=B * in_features * x.dtype.itemsize + B * 4 + param_bytes,
    )

    out = pl.pallas_call(
        kernel,
        out_shape=jax.ShapeDtypeStruct((1, b_out), jnp.float32),
        grid=(n_steps,),
        in_specs=in_specs,
        out_specs=pl.BlockSpec((1, tile), lambda i: (0, i)),
        compiler_params=pltpu.CompilerParams(
            dimension_semantics=("parallel",),
            vmem_limit_bytes=_VMEM_LIMIT_BYTES,
        ),
        cost_estimate=cost,
    )(*kernel_args)

    # Columns >= B hold ragged-tail / pad-row garbage; slice before returning.
    return jnp.transpose(out[:, :B])  # (B, 1)


def init_regressor_params(key, input_size):
    """Deterministic init mimicking PyTorch nn.Linear default
    (uniform in [-1/sqrt(fan_in), 1/sqrt(fan_in)])."""
    dims = [(input_size, 64), (64, 32), (32, 16), (16, 8), (8, 1)]
    params = []
    for (fan_in, fan_out) in dims:
        key, kw, kb = jax.random.split(key, 3)
        bound = 1.0 / math.sqrt(fan_in)
        w = jax.random.uniform(kw, (fan_out, fan_in), jnp.float32,
                               minval=-bound, maxval=bound)
        b = jax.random.uniform(kb, (fan_out,), jnp.float32,
                               minval=-bound, maxval=bound)
        params.append((w, b))
    return params


def regressor_reference(x, params):
    """Pure-JAX reference of the PyTorch forward."""
    h = x
    for i, (w, b) in enumerate(params):
        h = h @ w.T + b
        if i < len(params) - 1:
            h = jnp.maximum(h, 0.0)
    return h


if __name__ == "__main__":
    key = jax.random.PRNGKey(0)
    k_x, k_x2, k_p = jax.random.split(key, 3)

    batch = 8
    input_size = 16
    x = jax.random.normal(k_x, (batch, input_size), jnp.float32)
    params = init_regressor_params(k_p, input_size)

    # f32 path (exact match to reference).
    params_f32 = prepare_regressor_params(params, jnp.float32)
    out = jax.block_until_ready(regressor_forward(x, params_f32))
    ref = regressor_reference(x, params)
    assert out.shape == (batch, 1), out.shape
    assert jnp.allclose(out, ref, atol=1e-5, rtol=1e-5), (out, ref)

    # Larger, unaligned batch: small tile_b forces grid=(2,) and a ragged
    # last block (masked boundary DMA on x).
    batch2 = 300
    x2 = jax.random.normal(k_x2, (batch2, input_size), jnp.float32)
    out2 = jax.block_until_ready(regressor_forward(x2, params_f32, tile_b=256))
    ref2 = regressor_reference(x2, params)
    assert out2.shape == (batch2, 1), out2.shape
    assert jnp.allclose(out2, ref2, atol=1e-5, rtol=1e-5)

    # Default bf16-matmul path (f32 accumulation / bias / ReLU) — looser tolerance.
    params_bf16 = prepare_regressor_params(params)
    out_bf16 = jax.block_until_ready(regressor_forward(x, params_bf16))
    assert out_bf16.shape == (batch, 1), out_bf16.shape
    assert jnp.allclose(out_bf16, ref, atol=5e-2, rtol=5e-2), (out_bf16, ref)

    print("KERNEL_OK")
</pallas_src>

<mosaic_0001>
module attributes {stable_mosaic.version = 11 : i64} {
  func.func @_mlp_kernel(%arg0: i32, %arg1: memref<128x16xf32, #tpu.memory_space<vmem>>, %arg2: memref<64x16xf32, #tpu.memory_space<vmem>>, %arg3: memref<64x1xf32, #tpu.memory_space<vmem>>, %arg4: memref<32x64xf32, #tpu.memory_space<vmem>>, %arg5: memref<32x1xf32, #tpu.memory_space<vmem>>, %arg6: memref<16x32xf32, #tpu.memory_space<vmem>>, %arg7: memref<16x1xf32, #tpu.memory_space<vmem>>, %arg8: memref<8x16xf32, #tpu.memory_space<vmem>>, %arg9: memref<8x1xf32, #tpu.memory_space<vmem>>, %arg10: memref<1x8xf32, #tpu.memory_space<vmem>>, %arg11: memref<1x1xf32, #tpu.memory_space<vmem>>, %arg12: memref<1x128xf32, #tpu.memory_space<vmem>>) attributes {dimension_semantics = [#tpu.dimension_semantics<parallel>], iteration_bounds = array<i64: 1>, scalar_prefetch = 0 : i64, scratch_operands = 0 : i64, tpu.core_type = #tpu.core_type<tc>, window_params = [{transform_indices = @transform_0, window_bounds = array<i64: 128, 16>}, {pipeline_mode = #tpu.pipeline_mode<synchronous>, transform_indices = @transform_1, window_bounds = array<i64: 64, 16>}, {pipeline_mode = #tpu.pipeline_mode<synchronous>, transform_indices = @transform_2, window_bounds = array<i64: 64, 1>}, {pipeline_mode = #tpu.pipeline_mode<synchronous>, transform_indices = @transform_3, window_bounds = array<i64: 32, 64>}, {pipeline_mode = #tpu.pipeline_mode<synchronous>, transform_indices = @transform_4, window_bounds = array<i64: 32, 1>}, {pipeline_mode = #tpu.pipeline_mode<synchronous>, transform_indices = @transform_5, window_bounds = array<i64: 16, 32>}, {pipeline_mode = #tpu.pipeline_mode<synchronous>, transform_indices = @transform_6, window_bounds = array<i64: 16, 1>}, {pipeline_mode = #tpu.pipeline_mode<synchronous>, transform_indices = @transform_7, window_bounds = array<i64: 8, 16>}, {pipeline_mode = #tpu.pipeline_mode<synchronous>, transform_indices = @transform_8, window_bounds = array<i64: 8, 1>}, {pipeline_mode = #tpu.pipeline_mode<synchronous>, transform_indices = @transform_9, window_bounds = array<i64: 1, 8>}, {pipeline_mode = #tpu.pipeline_mode<synchronous>, transform_indices = @transform_10, window_bounds = array<i64: 1, 1>}, {transform_indices = @transform_11, window_bounds = array<i64: 1, 128>}]} {
    %c0 = arith.constant 0 : index
    %c0_0 = arith.constant 0 : index
    %0 = vector.load %arg2[%c0, %c0_0] : memref<64x16xf32, #tpu.memory_space<vmem>>, vector<64x16xf32>
    %c0_1 = arith.constant 0 : index
    %c0_2 = arith.constant 0 : index
    %1 = vector.load %arg3[%c0_1, %c0_2] : memref<64x1xf32, #tpu.memory_space<vmem>>, vector<64x1xf32>
    %c0_3 = arith.constant 0 : index
    %c0_4 = arith.constant 0 : index
    %2 = vector.load %arg4[%c0_3, %c0_4] : memref<32x64xf32, #tpu.memory_space<vmem>>, vector<32x64xf32>
    %c0_5 = arith.constant 0 : index
    %c0_6 = arith.constant 0 : index
    %3 = vector.load %arg5[%c0_5, %c0_6] : memref<32x1xf32, #tpu.memory_space<vmem>>, vector<32x1xf32>
    %c0_7 = arith.constant 0 : index
    %c0_8 = arith.constant 0 : index
    %4 = vector.load %arg6[%c0_7, %c0_8] : memref<16x32xf32, #tpu.memory_space<vmem>>, vector<16x32xf32>
    %c0_9 = arith.constant 0 : index
    %c0_10 = arith.constant 0 : index
    %5 = vector.load %arg7[%c0_9, %c0_10] : memref<16x1xf32, #tpu.memory_space<vmem>>, vector<16x1xf32>
    %c0_11 = arith.constant 0 : index
    %c0_12 = arith.constant 0 : index
    %6 = vector.load %arg8[%c0_11, %c0_12] : memref<8x16xf32, #tpu.memory_space<vmem>>, vector<8x16xf32>
    %c0_13 = arith.constant 0 : index
    %c0_14 = arith.constant 0 : index
    %7 = vector.load %arg9[%c0_13, %c0_14] : memref<8x1xf32, #tpu.memory_space<vmem>>, vector<8x1xf32>
    %c0_15 = arith.constant 0 : index
    %c0_16 = arith.constant 0 : index
    %8 = vector.load %arg10[%c0_15, %c0_16] : memref<1x8xf32, #tpu.memory_space<vmem>>, vector<1x8xf32>
    %c0_17 = arith.constant 0 : index
    %c0_18 = arith.constant 0 : index
    %9 = vector.load %arg11[%c0_17, %c0_18] : memref<1x1xf32, #tpu.memory_space<vmem>>, vector<1x1xf32>
    %c0_i32 = arith.constant 0 : i32
    %c128_i32 = arith.constant 128 : i32
    %10 = arith.muli %c0_i32, %c128_i32 : i32
    %11 = tpu.assume_multiple %10, 128 : i32
    %12 = arith.index_cast %11 : i32 to index
    %c0_19 = arith.constant 0 : index
    %13 = vector.load %arg1[%12, %c0_19] : memref<128x16xf32, #tpu.memory_space<vmem>>, vector<128x16xf32>
    %cst = arith.constant dense<0.000000e+00> : vector<64x128xf32>
    %14 = tpu.matmul %0, %13, %cst {dimension_numbers = #tpu.dot_dimension_numbers<[1], [1], [0], [0], [0, 0, 1, 0], [], []>} : vector<64x16xf32>, vector<128x16xf32>, vector<64x128xf32> -> vector<64x128xf32>
    %15 = vector.broadcast %1 : vector<64x1xf32> to vector<64x128xf32>
    %16 = arith.addf %14, %15 : vector<64x128xf32>
    %cst_20 = arith.constant 0.000000e+00 : f32
    %17 = vector.broadcast %cst_20 : f32 to vector<64x128xf32>
    %18 = arith.maximumf %16, %17 : vector<64x128xf32>
    %cst_21 = arith.constant dense<0.000000e+00> : vector<32x128xf32>
    %19 = tpu.matmul %2, %18, %cst_21 {dimension_numbers = #tpu.dot_dimension_numbers<[1], [0], [0], [1], [0, 0, 1, 1], [], []>} : vector<32x64xf32>, vector<64x128xf32>, vector<32x128xf32> -> vector<32x128xf32>
    %20 = vector.broadcast %3 : vector<32x1xf32> to vector<32x128xf32>
    %21 = arith.addf %19, %20 : vector<32x128xf32>
    %cst_22 = arith.constant 0.000000e+00 : f32
    %22 = vector.broadcast %cst_22 : f32 to vector<32x128xf32>
    %23 = arith.maximumf %21, %22 : vector<32x128xf32>
    %cst_23 = arith.constant dense<0.000000e+00> : vector<16x128xf32>
    %24 = tpu.matmul %4, %23, %cst_23 {dimension_numbers = #tpu.dot_dimension_numbers<[1], [0], [0], [1], [0, 0, 1, 1], [], []>} : vector<16x32xf32>, vector<32x128xf32>, vector<16x128xf32> -> vector<16x128xf32>
    %25 = vector.broadcast %5 : vector<16x1xf32> to vector<16x128xf32>
    %26 = arith.addf %24, %25 : vector<16x128xf32>
    %cst_24 = arith.constant 0.000000e+00 : f32
    %27 = vector.broadcast %cst_24 : f32 to vector<16x128xf32>
    %28 = arith.maximumf %26, %27 : vector<16x128xf32>
    %cst_25 = arith.constant dense<0.000000e+00> : vector<8x128xf32>
    %29 = tpu.matmul %6, %28, %cst_25 {dimension_numbers = #tpu.dot_dimension_numbers<[1], [0], [0], [1], [0, 0, 1, 1], [], []>} : vector<8x16xf32>, vector<16x128xf32>, vector<8x128xf32> -> vector<8x128xf32>
    %30 = vector.broadcast %7 : vector<8x1xf32> to vector<8x128xf32>
    %31 = arith.addf %29, %30 : vector<8x128xf32>
    %cst_26 = arith.constant 0.000000e+00 : f32
    %32 = vector.broadcast %cst_26 : f32 to vector<8x128xf32>
    %33 = arith.maximumf %31, %32 : vector<8x128xf32>
    %cst_27 = arith.constant dense<0.000000e+00> : vector<1x128xf32>
    %34 = tpu.matmul %8, %33, %cst_27 {dimension_numbers = #tpu.dot_dimension_numbers<[1], [0], [0], [1], [0, 0, 1, 1], [], []>} : vector<1x8xf32>, vector<8x128xf32>, vector<1x128xf32> -> vector<1x128xf32>
    %35 = vector.broadcast %9 : vector<1x1xf32> to vector<1x128xf32>
    %36 = arith.addf %34, %35 : vector<1x128xf32>
    %c0_28 = arith.constant 0 : index
    %37 = arith.index_cast %11 : i32 to index
    %38 = vector.load %arg12[%c0_28, %37] : memref<1x128xf32, #tpu.memory_space<vmem>>, vector<1x128xf32>
    tpu.vector_store %arg12[%c0_28, %37], %36 {strides = array<i32>} : memref<1x128xf32, #tpu.memory_space<vmem>>, vector<1x128xf32>,
    %c1_i32 = arith.constant 1 : i32
    return
  }
  func.func @transform_0(%arg0: i32) -> (i32, i32) {
    %c0_i32 = arith.constant 0 : i32
    %c0_i32_0 = arith.constant 0 : i32
    return %arg0, %c0_i32 : i32, i32
  }
  func.func @transform_1(%arg0: i32) -> (i32, i32) {
    %c0_i32 = arith.constant 0 : i32
    %c0_i32_0 = arith.constant 0 : i32
    %c0_i32_1 = arith.constant 0 : i32
    return %c0_i32, %c0_i32_0 : i32, i32
  }
  func.func @transform_2(%arg0: i32) -> (i32, i32) {
    %c0_i32 = arith.constant 0 : i32
    %c0_i32_0 = arith.constant 0 : i32
    %c0_i32_1 = arith.constant 0 : i32
    return %c0_i32, %c0_i32_0 : i32, i32
  }
  func.func @transform_3(%arg0: i32) -> (i32, i32) {
    %c0_i32 = arith.constant 0 : i32
    %c0_i32_0 = arith.constant 0 : i32
    %c0_i32_1 = arith.constant 0 : i32
    return %c0_i32, %c0_i32_0 : i32, i32
  }
  func.func @transform_4(%arg0: i32) -> (i32, i32) {
    %c0_i32 = arith.constant 0 : i32
    %c0_i32_0 = arith.constant 0 : i32
    %c0_i32_1 = arith.constant 0 : i32
    return %c0_i32, %c0_i32_0 : i32, i32
  }
  func.func @transform_5(%arg0: i32) -> (i32, i32) {
    %c0_i32 = arith.constant 0 : i32
    %c0_i32_0 = arith.constant 0 : i32
    %c0_i32_1 = arith.constant 0 : i32
    return %c0_i32, %c0_i32_0 : i32, i32
  }
  func.func @transform_6(%arg0: i32) -> (i32, i32) {
    %c0_i32 = arith.constant 0 : i32
    %c0_i32_0 = arith.constant 0 : i32
    %c0_i32_1 = arith.constant 0 : i32
    return %c0_i32, %c0_i32_0 : i32, i32
  }
  func.func @transform_7(%arg0: i32) -> (i32, i32) {
    %c0_i32 = arith.constant 0 : i32
    %c0_i32_0 = arith.constant 0 : i32
    %c0_i32_1 = arith.constant 0 : i32
    return %c0_i32, %c0_i32_0 : i32, i32
  }
  func.func @transform_8(%arg0: i32) -> (i32, i32) {
    %c0_i32 = arith.constant 0 : i32
    %c0_i32_0 = arith.constant 0 : i32
    %c0_i32_1 = arith.constant 0 : i32
    return %c0_i32, %c0_i32_0 : i32, i32
  }
  func.func @transform_9(%arg0: i32) -> (i32, i32) {
    %c0_i32 = arith.constant 0 : i32
    %c0_i32_0 = arith.constant 0 : i32
    %c0_i32_1 = arith.constant 0 : i32
    return %c0_i32, %c0_i32_0 : i32, i32
  }
  func.func @transform_10(%arg0: i32) -> (i32, i32) {
    %c0_i32 = arith.constant 0 : i32
    %c0_i32_0 = arith.constant 0 : i32
    %c0_i32_1 = arith.constant 0 : i32
    return %c0_i32, %c0_i32_0 : i32, i32
  }
  func.func @transform_11(%arg0: i32) -> (i32, i32) {
    %c0_i32 = arith.constant 0 : i32
    %c0_i32_0 = arith.constant 0 : i32
    return %c0_i32, %arg0 : i32, i32
  }
}

</mosaic_0001>

<bundles_post_ra>
// kernel: tpu_custom_call.1
= control target key start
LH: loop header
LB: loop body
LE: loop exit
PB: predicated region body
PF: predicated region fallthrough
CT: control target
= control target key end

     0   :  { %s1258_s0 = inlined_call_operand.vmem [shape: f32[128,16], index: 0, kind: input, shape index: {}]   ;;  %s1259_s1 = inlined_call_operand.vmem [shape: f32[64,16], index: 1, kind: input, shape index: {}]   ;;  %s1260_s2 = inlined_call_operand.vmem [shape: f32[64,1], index: 2, kind: input, shape index: {}]   ;;  %s1261_s3 = inlined_call_operand.vmem [shape: f32[32,64], index: 3, kind: input, shape index: {}]   ;;  %s1262_s4 = inlined_call_operand.vmem [shape: f32[32,1], index: 4, kind: input, shape index: {}]   ;;  %s1263_s5 = inlined_call_operand.vmem [shape: f32[16,32], index: 5, kind: input, shape index: {}]   ;;  %s1264_s6 = inlined_call_operand.vmem [shape: f32[16,1], index: 6, kind: input, shape index: {}]   ;;  %s1265_s7 = inlined_call_operand.vmem [shape: f32[8,16], index: 7, kind: input, shape index: {}]   ;;  %s1266_s8 = inlined_call_operand.vmem [shape: f32[8,1], index: 8, kind: input, shape index: {}]   ;;  %s1267_s9 = inlined_call_operand.vmem [shape: f32[1,8], index: 9, kind: input, shape index: {}]   ;;  %s1268_s10 = inlined_call_operand.<no memory space> [shape: f32[1,1], index: 10, kind: input, shape index: {}]   ;;  %s1269_s11 = inlined_call_operand.hbm [shape: f32[1,128], index: 11, kind: output, shape index: {}]  }
   0x1   :  { %v16_v0 = vstv %s1268_s10 }
   0x2   :  { %17 = vst [vmem:[#allocation2] sm:$0x1] %v16_v0 }
   0x3   :  { %v73_v1 = vld [vmem:[%s1258_s0] sm:$0xff]  ;;  %v74_v2 = vld [vmem:[%s1258_s0 + $0x8] sm:$0xff]  ;;  %vm129_vm0 = vcmask 130048   ;;  %v75_v3 = vld [vmem:[%s1258_s0 + $0x10] sm:$0xff]  ;;  %v982_v7 = vmov 0  }
   0x4   :  { %v876_v4 = vpack.c.bf16 %v74_v2, %v73_v1  ;;  %vm1061_vm1 = vmpackc.low %vm129_vm0, %vm129_vm0  ;;  %v76_v6 = vld [vmem:[%s1258_s0 + $0x18] sm:$0xff]  ;;  %956 = vset.pattern.permute.xlu0 %v982_v7  ;;  %957 = vset.pattern.permute.xlu1 %v982_v7  ;;  %v41_v9 = vld [vmem:[%s1259_s1] sm:$0xff] }
   0x5   :  { %v882_v8 = vpack.c.bf16 %v76_v6, %v75_v3  ;;  %v77_v10 = vld [vmem:[%s1258_s0 + $0x20] sm:$0xff]  ;;  %v78_v11 = vld [vmem:[%s1258_s0 + $0x28] sm:$0xff]  ;;  %819 = vmatprep.mubr.msk.f32.mxu0 %vm129_vm0, %v41_v9  ;;  %v51_v13 = vld [vmem:[%s1260_s2 + $0x10] sm:$0xff] }
   0x6   :  { %878 = vmatprep.subr.msk.bf16.mxu0 %vm1061_vm1, %v876_v4  ;;  %v49_v12 = vld [vmem:[%s1260_s2] sm:$0xff]  ;;  %v888_v14 = vpack.c.bf16 %v78_v11, %v77_v10  ;;  %101 = vperm.xlu1 %957, %v51_v13   ;;  %v50_v15 = vld [vmem:[%s1260_s2 + $0x8] sm:$0xff]  ;;  %v52_v16 = vld [vmem:[%s1260_s2 + $0x18] sm:$0xff] }
   0x7   :  { %881 = vmatpush3.bf16.xpose.msk.msra.mxu0 %vm1061_vm1, %v876_v4  ;;  %91 = vperm.xlu0 %956, %v49_v12  }
   0x8   :  { %884 = vmatprep.subr.msk.bf16.mxu0 %vm1061_vm1, %v882_v8 }
   0xb   :  { %96 = vperm.xlu0 %956, %v50_v15  }
   0xf   :  { %887 = vmatpush3.bf16.xpose.msk.msra.mxu0 %vm1061_vm1, %v882_v8 }
  0x10   :  { %890 = vmatprep.subr.msk.bf16.mxu0 %vm1061_vm1, %v888_v14 }
  0x11   :  { %18 = vsyncpa [#allocation4], 0  ;;  %v79_v17 = vld [vmem:[%s1258_s0 + $0x30] sm:$0xff]  ;;  %v80_v18 = vld [vmem:[%s1258_s0 + $0x38] sm:$0xff]  ;;  %106 = vperm.xlu1 %957, %v52_v16   ;;  %vm335_vm2 = vcmask 523264   ;;  %vm447_vm3 = vcmask 261120  }
  0x12   :  { %v53_v19 = vld [vmem:[%s1260_s2 + $0x20] sm:$0xff]  ;;  %v54_v20 = vld [vmem:[%s1260_s2 + $0x28] sm:$0xff]  ;;  %v894_v21 = vpack.c.bf16 %v80_v18, %v79_v17  ;;  %v55_v22 = vld [vmem:[%s1260_s2 + $0x30] sm:$0xff]  ;;  %vm984_vm4 = vmmov 0   ;;  %vm619_vm5 = vcmask 64512  }
  0x13   :  { %111 = vperm.xlu0 %956, %v53_v19   ;;  %v56_v23 = vld [vmem:[%s1260_s2 + $0x38] sm:$0xff]  ;;  %v81_v24 = vld [vmem:[%s1258_s0 + $0x40] sm:$0xff]  ;;  %v82_v25 = vld [vmem:[%s1258_s0 + $0x48] sm:$0xff] }
  0x14   :  { %v61_v26 = vld [vmem:[%s1262_s4] sm:$0xff]  ;;  %v62_v27 = vld [vmem:[%s1262_s4 + $0x8] sm:$0xff]  ;;  %v900_v28 = vpack.c.bf16 %v82_v25, %v81_v24  ;;  %v63_v29 = vld [vmem:[%s1262_s4 + $0x10] sm:$0xff] }
  0x15   :  { %116 = vperm.xlu1 %957, %v54_v20   ;;  %v64_v30 = vld [vmem:[%s1262_s4 + $0x18] sm:$0xff]  ;;  %v83_v31 = vld [vmem:[%s1258_s0 + $0x50] sm:$0xff]  ;;  %v67_v33 = vld [vmem:[%s1264_s6] sm:$0xff] }
  0x16   :  { %v84_v32 = vld [vmem:[%s1258_s0 + $0x58] sm:$0xff]  ;;  %v68_v34 = vld [vmem:[%s1264_s6 + $0x8] sm:$0xff]  ;;  %v70_v36 = vld [vmem:[%s1266_s8] sm:$0xff] }
  0x17   :  { %893 = vmatpush3.bf16.xpose.msk.msra.mxu0 %vm1061_vm1, %v888_v14  ;;  %121 = vperm.xlu0 %956, %v55_v22   ;;  %v906_v35 = vpack.c.bf16 %v84_v32, %v83_v31  ;;  %v72_v37 = vld [vmem:[#allocation2] sm:$0x1]  ;;  %v86_v39 = vld [vmem:[%s1258_s0 + $0x68] sm:$0xff]  ;;  %v87_v41 = vld [vmem:[%s1258_s0 + $0x70] sm:$0xff] }
  0x18   :  { %896 = vmatprep.subr.msk.bf16.mxu0 %vm1061_vm1, %v894_v21  ;;  %v85_v38 = vld [vmem:[%s1258_s0 + $0x60] sm:$0xff]  ;;  %v88_v42 = vld [vmem:[%s1258_s0 + $0x78] sm:$0xff]  ;;  %v42_v44 = vld [vmem:[%s1259_s1 + $0x8] sm:$0xff] }
  0x19   :  { %126 = vperm.xlu1 %957, %v56_v23   ;;  %v912_v40 = vpack.c.bf16 %v86_v39, %v85_v38  ;;  %v918_v43 = vpack.c.bf16 %v88_v42, %v87_v41  ;;  %v43_v45 = vld [vmem:[%s1259_s1 + $0x10] sm:$0xff]  ;;  %v44_v46 = vld [vmem:[%s1259_s1 + $0x18] sm:$0xff]  ;;  %v45_v47 = vld [vmem:[%s1259_s1 + $0x20] sm:$0xff] }
  0x1a   :  { %v46_v48 = vld [vmem:[%s1259_s1 + $0x28] sm:$0xff]  ;;  %v47_v49 = vld [vmem:[%s1259_s1 + $0x30] sm:$0xff]  ;;  %v48_v50 = vld [vmem:[%s1259_s1 + $0x38] sm:$0xff] }
  0x1b   :  { %317 = vperm.xlu0 %956, %v61_v26   ;;  %v57_v51 = vld [vmem:[%s1261_s3] sm:$0xff]  ;;  %v58_v24 = vld [vmem:[%s1261_s3 + $0x8] sm:$0xff]  ;;  %v59_v25 = vld [vmem:[%s1261_s3 + $0x10] sm:$0xff] }
  0x1c   :  { %847 = vmatprep.mubr.msk.f32.mxu1 %vm335_vm2, %v57_v51  ;;  %v60_v26 = vld [vmem:[%s1261_s3 + $0x18] sm:$0xff] }
  0x1d   :  { %322 = vperm.xlu1 %957, %v62_v27   ;;  %v65_v27 = vld [vmem:[%s1263_s5] sm:$0xff] }
  0x1f   :  { %899 = vmatpush3.bf16.xpose.msk.msra.mxu0 %vm1061_vm1, %v894_v21  ;;  %327 = vperm.xlu0 %956, %v63_v29  }
  0x20   :  { %902 = vmatprep.subr.msk.bf16.mxu0 %vm1061_vm1, %v900_v28 }
  0x21   :  { %332 = vperm.xlu1 %957, %v64_v30  }
  0x23   :  { %439 = vperm.xlu0 %956, %v67_v33  }
  0x25   :  { %444 = vperm.xlu1 %957, %v68_v34  }
  0x27   :  { %905 = vmatpush3.bf16.xpose.msk.msra.mxu0 %vm1061_vm1, %v900_v28  ;;  %533 = vperm.xlu0 %956, %v70_v36  }
  0x28   :  { %908 = vmatprep.subr.msk.bf16.mxu0 %vm1061_vm1, %v906_v35 }
  0x29   :  { %612 = vperm.xlu1 %957, %v72_v37  }
  0x2f   :  { %911 = vmatpush3.bf16.xpose.msk.msra.mxu0 %vm1061_vm1, %v906_v35 }
  0x30   :  { %914 = vmatprep.subr.msk.bf16.mxu0 %vm1061_vm1, %v912_v40 }
  0x37   :  { %917 = vmatpush3.bf16.xpose.msk.msra.mxu0 %vm1061_vm1, %v912_v40 }
  0x38   :  { %920 = vmatprep.subr.msk.bf16.mxu0 %vm1061_vm1, %v918_v43 }
  0x3f   :  { %923 = vmatpush3.bf16.xpose.msk.msra.mxu0 %vm1061_vm1, %v918_v43 }
  0x46   :  { %820 = vmatmul.mubr.msk.f32.vlgmr.msra.gmra.mrb[0].mxu0 %vm129_vm0, %v42_v44 }
  0x47   :  { %822 = vmatprep.mubr.msk.f32.mxu0 %vm129_vm0, %v43_v45 }
  0x4a   :  { %823 = vmatmul.mubr.msk.f32.gmra.mrb[2].mxu0 %vm129_vm0, %v44_v46  ;;  %v66_v46 = vld [vmem:[%s1263_s5 + $0x8] sm:$0xff] }
  0x4b   :  { %825 = vmatprep.mubr.msk.f32.mxu0 %vm129_vm0, %v45_v47  ;;  %v983_v47 = vmov 0.0|0.0  }
  0x4e   :  { %826 = vmatmul.mubr.msk.f32.gmra.mrb[4].mxu0 %vm129_vm0, %v46_v48  ;;  %v985_v48 = vmov 0.0  }
  0x4f   :  { %828 = vmatprep.mubr.msk.f32.mxu0 %vm129_vm0, %v47_v49 }
  0x52   :  { %829 = vmatmul.mubr.msk.f32.gmra.mrb[6].mxu0 %vm129_vm0, %v48_v50 }
  0x85   :  { %v102_v53 = vpop.permute.xlu1 %101 }
  0x86   :  { %v92_v52 = vpop.permute.xlu0 %91 }
  0x8a   :  { %v97_v54 = vpop.permute.xlu0 %96 }
  0x90   :  { %v107_v55 = vpop.permute.xlu1 %106 }
  0x92   :  { %v112_v4 = vpop.permute.xlu0 %111 }
  0x94   :  { %v117_v1 = vpop.permute.xlu1 %116 }
  0x96   :  { %v122_v16 = vpop.permute.xlu0 %121 }
  0x98   :  { %v127_v13 = vpop.permute.xlu1 %126 }
  0x9a   :  { %v318_v29 = vpop.permute.xlu0 %317 }
  0x9c   :  { %v323_v28 = vpop.permute.xlu1 %322 }
  0x9e   :  { %v328_v38 = vpop.permute.xlu0 %327 }
  0xa0   :  { %v333_v35 = vpop.permute.xlu1 %332 }
  0xa2   :  { %v440_v51 = vpop.permute.xlu0 %439 }
  0xa4   :  { %v445_v49 = vpop.permute.xlu1 %444 }
 0x119   :  { %v821_v56 = vpop.f32.mrb[0].mxu0 }
 0x11a   :  { %v274_v57 = vadd.f32 %v821_v56, %v97_v54  ;;  %v268_v58 = vpop.f32.mrb[1].mxu0 }
 0x11b   :  { %v269_v59 = vadd.f32 %v268_v58, %v92_v52  ;;  %v69_v58 = vld [vmem:[%s1265_s7] sm:$0xff]  ;;  %s986_s7 = smov [#allocation3]  }
 0x11c   :  { %v308_v60 = vmax.f32 %v274_v57, 0.0  ;;  %s700_s20 = sshll.u32 %s986_s7, 4  ;;  %s701_s20 = int_to_ptr.vmem [resolvable:$true] %s700_s20 }
 0x11d   :  { %v307_v61 = vmax.f32 %v269_v59, 0.0  ;;  %v824_v62 = vpop.f32.mrb[2].mxu0  ;;  %v534_v59 = vpop.permute.xlu0 %533  ;;  %s958_s21 = scalar_lea.vmem %s701_s20, 16  ;;  %s962_s0 = scalar_lea.vmem %s701_s20, 32 }
 0x11e   :  { %v284_v63 = vadd.f32 %v824_v62, %v107_v55  ;;  %v278_v0 = vpop.f32.mrb[3].mxu0  ;;  %p959_p0 = scmp.ne.s32.totalorder %s701_s20, %s958_s21  ;;  %p963_p1 = scmp.lt.s32.totalorder %s701_s20, %s701_s20 }
 0x11f   :  { %v279_v2 = vadd.f32 %v278_v0, %v102_v53  ;;  %v924_v3 = vpack.c.bf16 %v308_v60, %v307_v61  ;;  %v71_v0 = vld [vmem:[%s1267_s9] sm:$0x1]  ;;  %p964_p2 = scmp.lt.s32.totalorder %s962_s0, %s958_s21 }
 0x120   :  { %v310_v5 = vmax.f32 %v284_v63, 0.0 }
 0x121   :  { %v309_v6 = vmax.f32 %v279_v2, 0.0  ;;  %v827_v7 = vpop.f32.mrb[4].mxu0  ;;  %925 = vmatprep.subr.bf16.mxu1 %v924_v3  ;;  %p965_p3 = por %p964_p2, %p963_p1 }
 0x122   :  { %v294_v8 = vadd.f32 %v827_v7, %v117_v1  ;;  %v288_v9 = vpop.f32.mrb[5].mxu0  ;;  %927 = vmatpush3.bf16.msra.mxu1 %v924_v3  ;;  %v615_v1 = vlaneseq }
 0x123   :  { %v928_v10 = vpack.c.bf16 %v310_v5, %v309_v6  ;;  %v289_v11 = vadd.f32 %v288_v9, %v112_v4  ;;  %v613_v4 = vpop.permute.xlu1 %612  ;;  %p966_p4 = pnand %p965_p3, %p959_p0 }
 0x124   :  { %v312_v12 = vmax.f32 %v294_v8, 0.0  ;;  %v616_v2 = vshrl.u32 %v615_v1, 7 }
 0x125   :  { %v311_v14 = vmax.f32 %v289_v11, 0.0  ;;  %v830_v15 = vpop.f32.mrb[6].mxu0  ;;  %929 = vmatprep.subr.bf16.mxu1 %v928_v10 }
 0x126   :  { %v304_v17 = vadd.f32 %v830_v15, %v127_v13  ;;  %v298_v18 = vpop.f32.mrb[7].mxu0  ;;  %931 = vmatpush3.bf16.msra.mxu1 %v928_v10  ;;  %v617_v3 = vsub.s32 0, %v616_v2 }
 0x127   :  { %v932_v19 = vpack.c.bf16 %v312_v12, %v311_v14  ;;  %v299_v20 = vadd.f32 %v298_v18, %v122_v16 }
 0x128   :  { %v314_v21 = vmax.f32 %v304_v17, 0.0  ;;  %v618_v5 = vrot.slane %v613_v4, %v617_v3 }
 0x129   :  { %v313_v22 = vmax.f32 %v299_v20, 0.0  ;;  %933 = vmatprep.subr.bf16.mxu1 %v932_v19 }
 0x12a   :  { %935 = vmatpush3.bf16.msra.mxu1 %v932_v19 }
 0x12b   :  { %v936_v23 = vpack.c.bf16 %v314_v21, %v313_v22 }
 0x12d   :  { %937 = vmatprep.subr.bf16.mxu1 %v936_v23 }
 0x12e   :  { %939 = vmatpush3.bf16.msra.mxu1 %v936_v23 }
 0x131   :  { %848 = vmatmul.mubr.msk.f32.vlgmr.msra.gmra.mrb[0].mxu1 %vm335_vm2, %v58_v24 }
 0x132   :  { %850 = vmatprep.mubr.msk.f32.mxu1 %vm335_vm2, %v59_v25 }
 0x135   :  { %851 = vmatmul.mubr.msk.f32.gmra.mrb[2].mxu1 %vm335_vm2, %v60_v26 }
 0x136   :  { %861 = vmatprep.mubr.msk.f32.mxu1 %vm447_vm3, %v65_v27 }
 0x204   :  { %v849_v30 = vpop.f32.mrb[0].mxu1 }
 0x205   :  { %v420_v31 = vadd.f32 %v849_v30, %v323_v28  ;;  %v414_v32 = vpop.f32.mrb[1].mxu1 }
 0x206   :  { %v415_v33 = vadd.f32 %v414_v32, %v318_v29 }
 0x207   :  { %v434_v34 = vmax.f32 %v420_v31, 0.0 }
 0x208   :  { %v433_v36 = vmax.f32 %v415_v33, 0.0  ;;  %v852_v37 = vpop.f32.mrb[2].mxu1 }
 0x209   :  { %v430_v39 = vadd.f32 %v852_v37, %v333_v35  ;;  %v424_v40 = vpop.f32.mrb[3].mxu1 }
 0x20a   :  { %v940_v41 = vpack.c.bf16 %v434_v34, %v433_v36  ;;  %v425_v42 = vadd.f32 %v424_v40, %v328_v38 }
 0x20b   :  { %v436_v43 = vmax.f32 %v430_v39, 0.0 }
 0x20c   :  { %v435_v44 = vmax.f32 %v425_v42, 0.0  ;;  %941 = vmatprep.subr.bf16.mxu1 %v940_v41 }
 0x20d   :  { %943 = vmatpush3.bf16.msra.mxu1 %v940_v41 }
 0x20e   :  { %v944_v45 = vpack.c.bf16 %v436_v43, %v435_v44 }
 0x210   :  { %945 = vmatprep.subr.bf16.mxu1 %v944_v45 }
 0x211   :  { %947 = vmatpush3.bf16.msra.mxu1 %v944_v45 }
 0x212   :  { %948 = vmatprep.subr.bf16.mxu1 %v983_v47 }
 0x214   :  { %862 = vmatmul.mubr.msk.f32.vlgmr.msra.gmra.mrb[4].mxu1 %vm447_vm3, %v66_v46 }
 0x215   :  { %868 = vmatprep.mubr.msk.f32.mxu1 %vm984_vm4, %v985_v48 }
 0x2e7   :  { %v863_v50 = vpop.f32.mrb[4].mxu1 }
 0x2e8   :  { %v526_v52 = vadd.f32 %v863_v50, %v445_v49  ;;  %v520_v53 = vpop.f32.mrb[5].mxu1 }
 0x2e9   :  { %v521_v54 = vadd.f32 %v520_v53, %v440_v51 }
 0x2ea   :  { %v530_v55 = vmax.f32 %v526_v52, 0.0 }
 0x2eb   :  { %v529_v56 = vmax.f32 %v521_v54, 0.0 }
 0x2ed   :  { %v949_v57 = vpack.c.bf16 %v530_v55, %v529_v56 }
 0x2ef   :  { %950 = vmatpush3.bf16.msra.mxu1 %v949_v57 }
 0x2f0   :  { %871 = vmatprep.subr.mxu1 %v985_v48 }
 0x2f2   :  { %869 = vmatmul.mubr.msk.f32.vlgmr.msra.gmra.mrb[6].mxu1 %vm129_vm0, %v69_v58 }
 0x2f3   :  { %873 = vmatprep.mubr.msk.f32.mxu1 %vm984_vm4, %v985_v48 }
 0x3c5   :  { %v605_v60 = vpop.f32.mrb[6].mxu1 }
 0x3c6   :  { %v606_v61 = vadd.f32 %v605_v60, %v534_v59  ;;  %v870_v62 = vpop.f32.mrb[7].mxu1 }
 0x3c8   :  { %v609_v63 = vmax.f32 %v606_v61, 0.0 }
 0x3ca   :  { %872 = vmatpush3.msra.mxu1 %v609_v63 }
 0x3cb   :  { %874 = vmatmul.mubr.msk.f32.vlgmr.msra.gmra.mrb[8].mxu1 %vm619_vm5, %v71_v0 }
 0x49e   :  { %v689_v6 = vpop.f32.mrb[8].mxu1 }
 0x49f   :  { %v690_v7 = vadd.f32 %v689_v6, %v618_v5  ;;  %v875_v8 = vpop.f32.mrb[9].mxu1 }
 0x4a1   :  { %693 = vst [vmem:[#allocation3] sm:$0x1] %v690_v7 }
 0x4a2   :  { %969 = shalt.err (!%p966_p4)
}
 0x4a3   :  { %s970_s23 = scalar_lea.hbm %s1269_s11, 16 }
 0x4a4   :  { %p971_p5 = scmp.ne.s32.totalorder %s1269_s11, %s970_s23  ;;  %p974_p6 = scmp.lt.u32.totalorder %s970_s23, %s1269_s11 }
 0x4a6   :  { %p976_p7 = pnand %p974_p6, %p971_p5 }
 0x4a8   :  { %979 = shalt.err (!%p976_p7)
}
 0x4a9   :  { %703 = dma.vmem_to_hbm [thread:$0]  %s701_s20, 16, %s1269_s11, [#allocation4]  }
 0x4aa   :  { %980 = dma.done.wait [#allocation4], 16  }
 0x4ab   :  { %981 = vsyncadd [#allocation4], 4294967280 }
 0x4ac   :  { %707 = vsyncpa [#allocation4], 1 }

</bundles_post_ra>
